<compile_context>
chip_gen: v6e
topology: v6e:2x2x1
jax: 0.10.0
libtpu: 0.0.40
codegen_flags: <defaults>
</compile_context>

<pallas_src>
import jax
import jax.numpy as jnp
from jax.experimental import pallas as pl
from jax.experimental.pallas import tpu as pltpu


def _cdiv(a: int, b: int) -> int:
    return -(-a // b)


def _rup(a: int, b: int) -> int:
    return _cdiv(a, b) * b


# ----------------------------------------------------------------------------------
# Kernel
# ----------------------------------------------------------------------------------
def _make_rope_kernel(d: int, pack: int):
    """Kernel for blocks:
         cos_ref, sin_ref : (ts, 1, pack*d) float32  (sin carries the rotate-half signs)
         x_ref,  o_ref    : (ts, Rp, pack*d)         (`pack` heads per 128-lane group)
    """
    d_2 = d // 2

    def kernel(cos_ref, sin_ref, x_ref, o_ref):
        x = x_ref[...]
        if pack == 1:
            # shift == (lane width)/2, so rotation direction is irrelevant; XLU slot.
            partner = pltpu.roll(x, shift=d_2, axis=2)
        else:
            # heads are lane-packed: rotate-half independently inside each d-wide
            # lane group with static slices + concat (direction-unambiguous).
            parts = []
            for h in range(pack):
                lo = h * d
                parts.append(x[..., lo + d_2: lo + d])
                parts.append(x[..., lo: lo + d_2])
            partner = jnp.concatenate(parts, axis=-1)
        # out = x * cos(m*theta) + [-x2, x1] * sin(m*theta); signs live in sin_ref.
        out = x * cos_ref[...] + partner * sin_ref[...]
        o_ref[...] = out.astype(o_ref.dtype)

    return kernel


# ----------------------------------------------------------------------------------
# Wrapper helpers
# ----------------------------------------------------------------------------------
def make_rope_theta(d: int, base: int = 10000) -> jnp.ndarray:
    """Matches the PyTorch nn.Parameter init: 1 / base^(2i/d), shape (d//2,)."""
    return 1.0 / (base ** (jnp.arange(0, d, 2, dtype=jnp.float32) / d))


def make_rope_tables(seq_len: int, theta: jnp.ndarray, pack: int = 1):
    """cos / sign-baked-sin tables, shape (seq_len, 1, pack * d).

    Hoist/cache these per (seq_len, d, base, pack) and pass them via
    rope_forward(..., tables=(cos_t, sin_t)) to avoid recomputing transcendentals
    (and the extra HBM round trip) on every layer."""
    pos = jnp.arange(seq_len, dtype=jnp.float32)
    ang = pos[:, None] * theta.astype(jnp.float32)[None, :]           # (S, d/2)
    cos_t = jnp.concatenate([jnp.cos(ang), jnp.cos(ang)], axis=-1)    # (S, d)
    sin_t = jnp.concatenate([-jnp.sin(ang), jnp.sin(ang)], axis=-1)   # sign baked in
    if pack > 1:
        cos_t = jnp.tile(cos_t, (1, pack))
        sin_t = jnp.tile(sin_t, (1, pack))
    return cos_t[:, None, :], sin_t[:, None, :]


def _chip_config():
    """(tensorcores_per_device, vmem_limit_bytes_or_None, vmem_buffer_budget_bytes)."""
    try:
        kind = jax.devices()[0].device_kind.lower()
    except Exception:
        kind = ""
    mib = 1 << 20
    if "v7" in kind:
        # 2 TensorCores/chip, only 64 MiB VMEM per TC -> smaller budget, explicit headroom.
        return 2, 48 * mib, 16 * mib
    if "v6" in kind or "v5" in kind:
        # 1 TensorCore, 128 MiB physical VMEM; default scoped limit is small, so raise it.
        return 1, 64 * mib, 24 * mib
    if "v4" in kind:
        # megacore: 2 TensorCores; stay conservative on limits.
        return 2, None, 8 * mib
    return 1, None, 8 * mib   # unknown generation: conservative, compiler-default limit


def _pack_factor(n_rows: int, d: int) -> int:
    """Largest p with p*d <= 128 and p | n_rows (lane-dense packing of heads)."""
    if d >= 128:
        return 1
    p = min(max(1, 128 // d), n_rows)
    while p > 1 and n_rows % p != 0:
        p -= 1
    return p


def _choose_seq_tile(S: int, row_bytes: int, budget_bytes: int, num_tc: int) -> int:
    """Largest multiple-of-8 seq tile whose double-buffered footprint fits the budget;
    on multi-TensorCore chips, best-effort rebalance so the step count is a multiple
    of the core count (avoids one core doing 2/3 of the work)."""
    ts = int(budget_bytes // (2 * row_bytes))           # x2: double buffering
    ts = min(S, max(8, (ts // 8) * 8))
    if num_tc <= 1 or S <= 8 * num_tc:
        return ts                                       # 1 TC: never force extra steps
    steps = max(_cdiv(S, ts), 2 * num_tc)
    steps = _rup(steps, num_tc)
    steps = min(steps, _rup(_cdiv(S, 8), num_tc))
    ts_bal = min(S, max(8, _rup(_cdiv(S, steps), 8)))
    return min(ts, ts_bal)


# ----------------------------------------------------------------------------------
# Forward
# ----------------------------------------------------------------------------------
def rope_forward(x: jnp.ndarray, theta: jnp.ndarray, *,
                 tables=None,
                 donate_x: bool = False,
                 vmem_buffer_budget_bytes: int | None = None,
                 vmem_limit_bytes: int | None = None) -> jnp.ndarray:
    """x: [seq_len, batch, n_heads, d], theta: [d//2]. Returns RoPE-rotated x."""
    S, B, H, D = x.shape
    assert D % 2 == 0, "RoPE requires an even feature dimension"
    assert theta.shape == (D // 2,)
    R = B * H

    num_tc, default_limit, default_budget = _chip_config()
    budget = default_budget if vmem_buffer_budget_bytes is None else vmem_buffer_budget_bytes
    limit = default_limit if vmem_limit_bytes is None else vmem_limit_bytes

    # ---- lane-dense packing: lay `pack` heads side by side along the 128-lane axis ----
    pack = _pack_factor(R, D)
    Rp, Dp = R // pack, pack * D
    xr = x.reshape(S, Rp, Dp)                 # pure (contiguous) reshape, no HBM copy

    # ---- cos / sign-baked-sin tables (hoist via `tables=` for per-layer reuse) --------
    if tables is None:
        cos_t, sin_t = make_rope_tables(S, theta, pack)
    else:
        cos_t, sin_t = tables
    assert cos_t.shape == (S, 1, Dp) and sin_t.shape == (S, 1, Dp)

    # ---- VMEM-budget-driven sequence tile, charging real (8,128)-padded footprints ----
    itemsize = jnp.dtype(x.dtype).itemsize
    sublane = 8 * max(1, 4 // itemsize)       # 8 for f32, 16 for bf16, 32 for int8
    rp_pad = _rup(Rp, sublane)
    dp_pad = _rup(Dp, 128)
    x_row = 2 * rp_pad * dp_pad * itemsize    # x-in + out blocks, per seq row
    tbl_row = 2 * 8 * dp_pad * 4              # cos + sin blocks: sublane dim pads 1 -> 8
    row_bytes = x_row + tbl_row

    ts = _choose_seq_tile(S, row_bytes, budget, num_tc)
    grid = _cdiv(S, ts)

    out = pl.pallas_call(
        _make_rope_kernel(D, pack),
        out_shape=jax.ShapeDtypeStruct((S, Rp, Dp), x.dtype),
        grid_spec=pltpu.PrefetchScalarGridSpec(
            num_scalar_prefetch=0,
            grid=(grid,),
            in_specs=[
                pl.BlockSpec((ts, 1, Dp), lambda i: (i, 0, 0)),    # cos table
                pl.BlockSpec((ts, 1, Dp), lambda i: (i, 0, 0)),    # signed sin table
                pl.BlockSpec((ts, Rp, Dp), lambda i: (i, 0, 0)),   # x tile
            ],
            out_specs=pl.BlockSpec((ts, Rp, Dp), lambda i: (i, 0, 0)),
        ),
        compiler_params=pltpu.CompilerParams(
            dimension_semantics=("parallel",),
            vmem_limit_bytes=limit,
        ),
        input_output_aliases=({2: 0} if donate_x else {}),
    )(cos_t, sin_t, xr)

    return out.reshape(S, B, H, D)


# ----------------------------------------------------------------------------------
# Reference & test
# ----------------------------------------------------------------------------------
def rope_reference(x: jnp.ndarray, theta: jnp.ndarray) -> jnp.ndarray:
    """Plain-JAX transcription of the PyTorch forward (rotate-half convention)."""
    S, B, H, D = x.shape
    d_2 = D // 2
    seq_idx = jnp.arange(S, dtype=jnp.float32)
    idx_theta = jnp.einsum("n,d->nd", seq_idx, theta)
    idx_theta2 = jnp.concatenate([idx_theta, idx_theta], axis=1)
    neg_half_x = jnp.concatenate([-x[:, :, :, d_2:], x[:, :, :, :d_2]], axis=-1)
    return (x * jnp.cos(idx_theta2)[:, None, None, :]
            + neg_half_x * jnp.sin(idx_theta2)[:, None, None, :])


if __name__ == "__main__":
    key = jax.random.PRNGKey(0)
    k1, k2, k3 = jax.random.split(key, 3)

    # Case 1: small shape consistent with the module; D=32 -> 4 heads lane-packed.
    S, B, H, D = 8, 2, 4, 32
    x = jax.random.normal(k1, (S, B, H, D), dtype=jnp.float32)
    theta = make_rope_theta(D, base=10000)
    out = jax.block_until_ready(rope_forward(x, theta))
    ref = rope_reference(x, theta)
    assert out.shape == x.shape and out.dtype == x.dtype
    assert jnp.allclose(out, ref, atol=1e-5, rtol=1e-5)

    # Case 2: longer sequence + tiny explicit budget -> multi-step pipelined grid,
    # D=64 -> 2 heads lane-packed.
    S2, B2, H2, D2 = 24, 1, 2, 64
    x2 = jax.random.normal(k2, (S2, B2, H2, D2), dtype=jnp.float32)
    theta2 = make_rope_theta(D2, base=10000)
    out2 = jax.block_until_ready(
        rope_forward(x2, theta2, vmem_buffer_budget_bytes=16 * 1024))
    ref2 = rope_reference(x2, theta2)
    assert out2.shape == x2.shape and out2.dtype == x2.dtype
    assert jnp.allclose(out2, ref2, atol=1e-5, rtol=1e-5)

    # Case 3: D=128 -> no packing, single XLU-roll path (odd head count).
    S3, B3, H3, D3 = 16, 1, 3, 128
    x3 = jax.random.normal(k3, (S3, B3, H3, D3), dtype=jnp.float32)
    theta3 = make_rope_theta(D3, base=10000)
    out3 = jax.block_until_ready(rope_forward(x3, theta3))
    ref3 = rope_reference(x3, theta3)
    assert out3.shape == x3.shape and out3.dtype == x3.dtype
    assert jnp.allclose(out3, ref3, atol=1e-5, rtol=1e-5)

    print("KERNEL_OK")
</pallas_src>

<mosaic_0001>
module attributes {stable_mosaic.version = 11 : i64} {
  func.func @kernel(%arg0: i32, %arg1: memref<8x1x128xf32, #tpu.memory_space<vmem>>, %arg2: memref<8x1x128xf32, #tpu.memory_space<vmem>>, %arg3: memref<8x2x128xf32, #tpu.memory_space<vmem>>, %arg4: memref<8x2x128xf32, #tpu.memory_space<vmem>>) attributes {dimension_semantics = [#tpu.dimension_semantics<parallel>], iteration_bounds = array<i64: 1>, scalar_prefetch = 0 : i64, scratch_operands = 0 : i64, tpu.core_type = #tpu.core_type<tc>, window_params = [{transform_indices = @transform_0, window_bounds = array<i64: 8, 1, 128>}, {transform_indices = @transform_1, window_bounds = array<i64: 8, 1, 128>}, {transform_indices = @transform_2, window_bounds = array<i64: 8, 2, 128>}, {transform_indices = @transform_3, window_bounds = array<i64: 8, 2, 128>}]} {
    %c0 = arith.constant 0 : index
    %c0_0 = arith.constant 0 : index
    %c0_1 = arith.constant 0 : index
    %0 = vector.load %arg3[%c0, %c0_0, %c0_1] : memref<8x2x128xf32, #tpu.memory_space<vmem>>, vector<8x2x128xf32>
    %1 = vector.extract_strided_slice %0 {offsets = [0, 0, 16], sizes = [8, 2, 16], strides = [1, 1, 1]} : vector<8x2x128xf32> to vector<8x2x16xf32>
    %2 = vector.extract_strided_slice %0 {offsets = [0, 0, 0], sizes = [8, 2, 16], strides = [1, 1, 1]} : vector<8x2x128xf32> to vector<8x2x16xf32>
    %3 = vector.extract_strided_slice %0 {offsets = [0, 0, 48], sizes = [8, 2, 16], strides = [1, 1, 1]} : vector<8x2x128xf32> to vector<8x2x16xf32>
    %4 = vector.extract_strided_slice %0 {offsets = [0, 0, 32], sizes = [8, 2, 16], strides = [1, 1, 1]} : vector<8x2x128xf32> to vector<8x2x16xf32>
    %5 = vector.extract_strided_slice %0 {offsets = [0, 0, 80], sizes = [8, 2, 16], strides = [1, 1, 1]} : vector<8x2x128xf32> to vector<8x2x16xf32>
    %6 = vector.extract_strided_slice %0 {offsets = [0, 0, 64], sizes = [8, 2, 16], strides = [1, 1, 1]} : vector<8x2x128xf32> to vector<8x2x16xf32>
    %7 = vector.extract_strided_slice %0 {offsets = [0, 0, 112], sizes = [8, 2, 16], strides = [1, 1, 1]} : vector<8x2x128xf32> to vector<8x2x16xf32>
    %8 = vector.extract_strided_slice %0 {offsets = [0, 0, 96], sizes = [8, 2, 16], strides = [1, 1, 1]} : vector<8x2x128xf32> to vector<8x2x16xf32>
    %9 = tpu.concatenate %1, %2, %3, %4, %5, %6, %7, %8 in 2 : vector<8x2x16xf32>, vector<8x2x16xf32>, vector<8x2x16xf32>, vector<8x2x16xf32>, vector<8x2x16xf32>, vector<8x2x16xf32>, vector<8x2x16xf32>, vector<8x2x16xf32> -> vector<8x2x128xf32>
    %c0_2 = arith.constant 0 : index
    %c0_3 = arith.constant 0 : index
    %c0_4 = arith.constant 0 : index
    %10 = vector.load %arg1[%c0_2, %c0_3, %c0_4] : memref<8x1x128xf32, #tpu.memory_space<vmem>>, vector<8x1x128xf32>
    %11 = vector.broadcast %10 : vector<8x1x128xf32> to vector<8x2x128xf32>
    %12 = arith.mulf %0, %11 : vector<8x2x128xf32>
    %c0_5 = arith.constant 0 : index
    %c0_6 = arith.constant 0 : index
    %c0_7 = arith.constant 0 : index
    %13 = vector.load %arg2[%c0_5, %c0_6, %c0_7] : memref<8x1x128xf32, #tpu.memory_space<vmem>>, vector<8x1x128xf32>
    %14 = vector.broadcast %13 : vector<8x1x128xf32> to vector<8x2x128xf32>
    %15 = arith.mulf %9, %14 : vector<8x2x128xf32>
    %16 = arith.addf %12, %15 : vector<8x2x128xf32>
    %c0_8 = arith.constant 0 : index
    %c0_9 = arith.constant 0 : index
    %c0_10 = arith.constant 0 : index
    %17 = vector.load %arg4[%c0_8, %c0_9, %c0_10] : memref<8x2x128xf32, #tpu.memory_space<vmem>>, vector<8x2x128xf32>
    tpu.vector_store %arg4[%c0_8, %c0_9, %c0_10], %16 {strides = array<i32>} : memref<8x2x128xf32, #tpu.memory_space<vmem>>, vector<8x2x128xf32>,
    return
  }
  func.func @transform_0(%arg0: i32) -> (i32, i32, i32) {
    %c0_i32 = arith.constant 0 : i32
    %c0_i32_0 = arith.constant 0 : i32
    %c0_i32_1 = arith.constant 0 : i32
    return %arg0, %c0_i32, %c0_i32_0 : i32, i32, i32
  }
  func.func @transform_1(%arg0: i32) -> (i32, i32, i32) {
    %c0_i32 = arith.constant 0 : i32
    %c0_i32_0 = arith.constant 0 : i32
    %c0_i32_1 = arith.constant 0 : i32
    return %arg0, %c0_i32, %c0_i32_0 : i32, i32, i32
  }
  func.func @transform_2(%arg0: i32) -> (i32, i32, i32) {
    %c0_i32 = arith.constant 0 : i32
    %c0_i32_0 = arith.constant 0 : i32
    %c0_i32_1 = arith.constant 0 : i32
    return %arg0, %c0_i32, %c0_i32_0 : i32, i32, i32
  }
  func.func @transform_3(%arg0: i32) -> (i32, i32, i32) {
    %c0_i32 = arith.constant 0 : i32
    %c0_i32_0 = arith.constant 0 : i32
    %c0_i32_1 = arith.constant 0 : i32
    return %arg0, %c0_i32, %c0_i32_0 : i32, i32, i32
  }
}

</mosaic_0001>

<bundles_post_ra>
// kernel: tpu_custom_call.1
= control target key start
LH: loop header
LB: loop body
LE: loop exit
PB: predicated region body
PF: predicated region fallthrough
CT: control target
= control target key end

     0   :  { %8 = vsyncpa [#allocation3], 0  ;;  %s629_s0 = inlined_call_operand.hbm [shape: f32[8,1,128], index: 0, kind: input, shape index: {}]   ;;  %s630_s1 = inlined_call_operand.hbm [shape: f32[8,1,128], index: 1, kind: input, shape index: {}]   ;;  %s631_s2 = inlined_call_operand.hbm [shape: f32[8,2,128], index: 2, kind: input, shape index: {}]   ;;  %s632_s3 = inlined_call_operand.hbm [shape: f32[8,2,128], index: 3, kind: output, shape index: {}]  }
   0x1   :  { %9 = vsyncpa [#allocation6], 0 }
   0x2   :  { %10 = vsyncpa [#allocation4], 0  ;;  %s456_s12 = smov [#allocation5]   ;;  %s457_s14 = smov [#allocation2]  }
   0x3   :  { %s28_s13 = sshll.u32 %s456_s12, 4  ;;  %s16_s15 = sshll.u32 %s457_s14, 4  ;;  %s29_s13 = int_to_ptr.vmem [resolvable:$true] %s28_s13  ;;  %s17_s15 = int_to_ptr.vmem [resolvable:$true] %s16_s15 }
   0x4   :  { %s378_s16 = scalar_lea.vmem %s29_s13, 128  ;;  %p383_p1 = scmp.lt.s32.totalorder %s29_s13, %s29_s13 }
   0x5   :  { %p379_p0 = scmp.ne.s32.totalorder %s29_s13, %s378_s16  ;;  %p384_p2 = scmp.lt.s32.totalorder %s378_s16, %s378_s16 }
   0x7   :  { %p385_p3 = por %p384_p2, %p383_p1 }
   0x9   :  { %p386_p4 = pnand %p385_p3, %p379_p0 }
   0xb   :  { %389 = shalt.err (!%p386_p4)
}
   0xc   :  { %s458_s17 = smov 16   ;;  %s459_s18 = smov 1  }
   0xd   :  { %34 = dma.hbm_to_vmem [thread:$0]  %s630_s1, 128, %s29_s13, [#allocation6], %s458_s17, %s458_s17, %s459_s18  }
   0xe   :  { %s398_s21 = scalar_lea.vmem %s17_s15, 128  ;;  %p403_p6 = scmp.lt.s32.totalorder %s17_s15, %s17_s15 }
   0xf   :  { %p399_p5 = scmp.ne.s32.totalorder %s17_s15, %s398_s21  ;;  %p404_p7 = scmp.lt.s32.totalorder %s398_s21, %s398_s21 }
  0x11   :  { %p405_p8 = por %p404_p7, %p403_p6 }
  0x13   :  { %p406_p9 = pnand %p405_p8, %p399_p5 }
  0x15   :  { %409 = shalt.err (!%p406_p9)
}
  0x16   :  { %22 = dma.hbm_to_vmem [thread:$0]  %s629_s0, 128, %s17_s15, [#allocation3], %s458_s17, %s458_s17, %s459_s18  }
  0x17   :  { %s460_s24 = smov [#allocation7]  }
  0x18   :  { %s40_s25 = sshll.u32 %s460_s24, 4  ;;  %s41_s25 = int_to_ptr.vmem [resolvable:$true] %s40_s25 }
  0x19   :  { %s418_s26 = scalar_lea.vmem %s41_s25, 256  ;;  %p423_p11 = scmp.lt.s32.totalorder %s41_s25, %s41_s25 }
  0x1a   :  { %p419_p10 = scmp.ne.s32.totalorder %s41_s25, %s418_s26  ;;  %p424_p12 = scmp.lt.s32.totalorder %s418_s26, %s418_s26 }
  0x1c   :  { %p425_p13 = por %p424_p12, %p423_p11 }
  0x1e   :  { %p426_p0 = pnand %p425_p13, %p419_p10 }
  0x20   :  { %429 = shalt.err (!%p426_p0)
}
  0x21   :  { %s461_s1 = smov 32   ;;  %s462_s27 = smov 2  }
  0x22   :  { %46 = dma.hbm_to_vmem [thread:$0]  %s631_s2, 256, %s41_s25, [#allocation6], %s461_s1, %s461_s1, %s462_s27  }
  0x23   :  { %450 = dma.done.wait [#allocation3], 128  }
  0x24   :  { %451 = vsyncadd [#allocation3], 4294967168 }
  0x25   :  { %452 = dma.done.wait [#allocation6], 384  }
  0x26   :  { %453 = vsyncadd [#allocation6], 4294966912  ;;  %v58_v0 = vld [vmem:[#allocation7 + $0x4] sm:$0x3]  ;;  %v56_v1 = vld [vmem:[#allocation7] sm:$0x3] }
  0x27   :  { %s463_s0 = smov 112   ;;  %v59_v2 = vld [vmem:[#allocation7 + $0x6] sm:$0x3]  ;;  %v57_v3 = vld [vmem:[#allocation7 + $0x2] sm:$0x3]  ;;  %vm120_vm0 = vcmask 130048  }
  0x28   :  { %76 = vrot.lane.b32.xlu1 %v58_v0, %s463_s0  ;;  %72 = vrot.lane.b32.xlu0 %v56_v1, %s463_s0  ;;  %v61_v4 = vld [vmem:[#allocation7 + $0xa] sm:$0x3]  ;;  %v60_v5 = vld [vmem:[#allocation7 + $0x8] sm:$0x3]  ;;  %v501_v6 = vld [vmem:[#allocation7 + $0xe] sm:$0x3] }
  0x29   :  { %v503_v7 = vld [vmem:[#allocation7 + $0xc] sm:$0x3]  ;;  %v347_v16 = vld [vmem:[#allocation2 + $0x2] ss:$0 sm:$0xff]  ;;  %v345_v17 = vld [vmem:[#allocation2] ss:$0 sm:$0xff] }
  0x2a   :  { %v348_v18 = vld [vmem:[#allocation2 + $0x3] ss:$0 sm:$0xff]  ;;  %v346_v19 = vld [vmem:[#allocation2 + $0x1] ss:$0 sm:$0xff]  ;;  %vm129_vm1 = vcmask 261120   ;;  %v529_v20 = vmul.f32 %v347_v16, %v58_v0  ;;  %vm138_vm2 = vcmask 392192   ;;  %v239_v24 = vmul.f32 %v345_v17, %v56_v1 }
  0x2b   :  { %v350_v21 = vld [vmem:[#allocation2 + $0x5] ss:$0 sm:$0xff]  ;;  %vm147_vm3 = vcmask 523264   ;;  %v531_v25 = vmul.f32 %v348_v18, %v59_v2  ;;  %v349_v26 = vld [vmem:[#allocation2 + $0x4] ss:$0 sm:$0xff]  ;;  %v240_v29 = vmul.f32 %v346_v19, %v57_v3  ;;  %vm156_vm4 = vcmask 654336  }
  0x2c   :  { %78 = vrot.lane.b32.xlu1 %v59_v2, %s463_s0  ;;  %74 = vrot.lane.b32.xlu0 %v57_v3, %s463_s0  ;;  %v537_v32 = vmul.f32 %v350_v21, %v61_v4  ;;  %vm165_vm5 = vcmask 785408   ;;  %v541_v35 = vmul.f32 %v349_v26, %v60_v5  ;;  %vm174_vm6 = vcmask 916480   ;;  %v354_v40 = vld [vmem:[#allocation5 + $0x1] ss:$0 sm:$0xff]  ;;  %v353_v42 = vld [vmem:[#allocation5] ss:$0 sm:$0xff] }
  0x2d   :  { %v356_v60 = vld [vmem:[#allocation5 + $0x3] ss:$0 sm:$0xff]  ;;  %v355_v62 = vld [vmem:[#allocation5 + $0x2] ss:$0 sm:$0xff]  ;;  %s464_s2 = smov [#allocation8]  }
  0x2e   :  { %s332_s30 = sshll.u32 %s464_s2, 4  ;;  %s333_s30 = int_to_ptr.vmem [resolvable:$true] %s332_s30 }
  0x2f   :  { %s430_s4 = scalar_lea.vmem %s333_s30, 256  ;;  %p435_p2 = scmp.lt.s32.totalorder %s333_s30, %s333_s30 }
  0x30   :  { %82 = vrot.lane.b32.xlu1 %v61_v4, %s463_s0  ;;  %80 = vrot.lane.b32.xlu0 %v60_v5, %s463_s0  ;;  %p431_p1 = scmp.ne.s32.totalorder %s333_s30, %s430_s4  ;;  %p436_p3 = scmp.lt.s32.totalorder %s430_s4, %s430_s4 }
  0x32   :  { %p437_p4 = por %p436_p3, %p435_p2 }
  0x34   :  { %86 = vrot.lane.b32.xlu1 %v501_v6, %s463_s0  ;;  %84 = vrot.lane.b32.xlu0 %v503_v7, %s463_s0  ;;  %p438_p5 = pnand %p437_p4, %p431_p1 }
  0x38   :  { %98 = vrot.lane.b32.xlu1 %v57_v3, %s458_s17  ;;  %96 = vrot.lane.b32.xlu0 %v56_v1, %s458_s17 }
  0x3c   :  { %102 = vrot.lane.b32.xlu1 %v59_v2, %s458_s17  ;;  %100 = vrot.lane.b32.xlu0 %v58_v0, %s458_s17 }
  0x40   :  { %106 = vrot.lane.b32.xlu1 %v61_v4, %s458_s17  ;;  %104 = vrot.lane.b32.xlu0 %v60_v5, %s458_s17 }
  0x44   :  { %110 = vrot.lane.b32.xlu1 %v501_v6, %s458_s17  ;;  %108 = vrot.lane.b32.xlu0 %v503_v7, %s458_s17 }
  0x9a   :  { %v517_v8 = vpop.permute.xlu1 %76  ;;  %v73_v9 = vpop.permute.xlu0 %72 }
  0x9e   :  { %v519_v10 = vpop.permute.xlu1 %78  ;;  %v75_v11 = vpop.permute.xlu0 %74 }
  0xa2   :  { %v521_v12 = vpop.permute.xlu1 %82  ;;  %v523_v13 = vpop.permute.xlu0 %80 }
  0xa6   :  { %v525_v14 = vpop.permute.xlu1 %86  ;;  %v527_v15 = vpop.permute.xlu0 %84 }
  0xaa   :  { %v99_v22 = vpop.permute.xlu1 %98  ;;  %v97_v23 = vpop.permute.xlu0 %96 }
  0xab   :  { %v122_v27 = vsel %vm120_vm0, %v75_v11, %v99_v22  ;;  %v121_v28 = vsel %vm120_vm0, %v73_v9, %v97_v23 }
  0xac   :  { %v131_v30 = vsel %vm129_vm1, %v122_v27, %v75_v11  ;;  %v130_v31 = vsel %vm129_vm1, %v121_v28, %v73_v9 }
  0xad   :  { %v140_v33 = vsel %vm138_vm2, %v131_v30, %v99_v22  ;;  %v139_v34 = vsel %vm138_vm2, %v130_v31, %v97_v23  ;;  %v358_v30 = vld [vmem:[#allocation5 + $0x5] ss:$0 sm:$0xff] }
  0xae   :  { %v149_v36 = vsel %vm147_vm3, %v140_v33, %v75_v11  ;;  %v148_v37 = vsel %vm147_vm3, %v139_v34, %v73_v9  ;;  %v103_v38 = vpop.permute.xlu1 %102  ;;  %v101_v39 = vpop.permute.xlu0 %100  ;;  %v357_v33 = vld [vmem:[#allocation5 + $0x4] ss:$0 sm:$0xff] }
  0xaf   :  { %v158_v41 = vsel %vm156_vm4, %v149_v36, %v99_v22  ;;  %v157_v43 = vsel %vm156_vm4, %v148_v37, %v97_v23  ;;  %v124_v44 = vsel %vm120_vm0, %v519_v10, %v103_v38  ;;  %v123_v45 = vsel %vm120_vm0, %v517_v8, %v101_v39  ;;  %v352_v36 = vld [vmem:[#allocation2 + $0x7] ss:$0 sm:$0xff]  ;;  %v351_v37 = vld [vmem:[#allocation2 + $0x6] ss:$0 sm:$0xff] }
  0xb0   :  { %v167_v46 = vsel %vm165_vm5, %v158_v41, %v75_v11  ;;  %v166_v47 = vsel %vm165_vm5, %v157_v43, %v73_v9  ;;  %v133_v48 = vsel %vm129_vm1, %v124_v44, %v519_v10  ;;  %v132_v49 = vsel %vm129_vm1, %v123_v45, %v517_v8 }
  0xb1   :  { %v176_v50 = vsel %vm174_vm6, %v167_v46, %v99_v22  ;;  %v175_v51 = vsel %vm174_vm6, %v166_v47, %v97_v23  ;;  %v142_v52 = vsel %vm138_vm2, %v133_v48, %v103_v38  ;;  %v141_v53 = vsel %vm138_vm2, %v132_v49, %v101_v39  ;;  %v360_v48 = vld [vmem:[#allocation5 + $0x7] ss:$0 sm:$0xff] }
  0xb2   :  { %v304_v54 = vmul.f32 %v354_v40, %v176_v50  ;;  %v303_v55 = vmul.f32 %v353_v42, %v175_v51  ;;  %v151_v56 = vsel %vm147_vm3, %v142_v52, %v519_v10  ;;  %v150_v57 = vsel %vm147_vm3, %v141_v53, %v517_v8  ;;  %v107_v58 = vpop.permute.xlu1 %106  ;;  %v105_v59 = vpop.permute.xlu0 %104  ;;  %v359_v50 = vld [vmem:[#allocation5 + $0x6] ss:$0 sm:$0xff] }
  0xb3   :  { %v160_v61 = vsel %vm156_vm4, %v151_v56, %v103_v38  ;;  %v159_v63 = vsel %vm156_vm4, %v150_v57, %v101_v39  ;;  %v126_v0 = vsel %vm120_vm0, %v521_v12, %v107_v58  ;;  %v125_v1 = vsel %vm120_vm0, %v523_v13, %v105_v59 }
  0xb4   :  { %v312_v2 = vadd.f32 %v304_v54, %v240_v29  ;;  %v311_v3 = vadd.f32 %v303_v55, %v239_v24  ;;  %v169_v4 = vsel %vm165_vm5, %v160_v61, %v519_v10  ;;  %v168_v5 = vsel %vm165_vm5, %v159_v63, %v517_v8 }
  0xb5   :  { %v178_v9 = vsel %vm174_vm6, %v169_v4, %v103_v38  ;;  %v177_v11 = vsel %vm174_vm6, %v168_v5, %v101_v39  ;;  %v135_v16 = vsel %vm129_vm1, %v126_v0, %v521_v12  ;;  %v134_v17 = vsel %vm129_vm1, %v125_v1, %v523_v13 }
  0xb6   :  { %320 = vst [vmem:[#allocation8 + $0x2] sm:$0x3] %v312_v2  ;;  %319 = vst [vmem:[#allocation8] sm:$0x3] %v311_v3  ;;  %v306_v18 = vmul.f32 %v356_v60, %v178_v9  ;;  %v305_v19 = vmul.f32 %v355_v62, %v177_v11  ;;  %v144_v21 = vsel %vm138_vm2, %v135_v16, %v107_v58  ;;  %v111_v22 = vpop.permute.xlu1 %110  ;;  %v109_v8 = vpop.permute.xlu0 %108 }
  0xb7   :  { %v143_v10 = vsel %vm138_vm2, %v134_v17, %v105_v59  ;;  %v153_v23 = vsel %vm147_vm3, %v144_v21, %v521_v12  ;;  %v128_v26 = vsel %vm120_vm0, %v525_v14, %v111_v22  ;;  %v127_v27 = vsel %vm120_vm0, %v527_v15, %v109_v8 }
  0xb8   :  { %v152_v24 = vsel %vm147_vm3, %v143_v10, %v523_v13  ;;  %v314_v28 = vadd.f32 %v306_v18, %v531_v25  ;;  %v313_v29 = vadd.f32 %v305_v19, %v529_v20  ;;  %v162_v31 = vsel %vm156_vm4, %v153_v23, %v107_v58 }
  0xb9   :  { %v161_v34 = vsel %vm156_vm4, %v152_v24, %v105_v59  ;;  %v171_v38 = vsel %vm165_vm5, %v162_v31, %v521_v12  ;;  %v137_v40 = vsel %vm129_vm1, %v128_v26, %v525_v14  ;;  %v136_v20 = vsel %vm129_vm1, %v127_v27, %v527_v15 }
  0xba   :  { %v170_v39 = vsel %vm165_vm5, %v161_v34, %v523_v13  ;;  %322 = vst [vmem:[#allocation8 + $0x6] sm:$0x3] %v314_v28  ;;  %321 = vst [vmem:[#allocation8 + $0x4] sm:$0x3] %v313_v29  ;;  %v180_v25 = vsel %vm174_vm6, %v171_v38, %v107_v58  ;;  %v146_v42 = vsel %vm138_vm2, %v137_v40, %v111_v22 }
  0xbb   :  { %v179_v41 = vsel %vm174_vm6, %v170_v39, %v105_v59  ;;  %v145_v43 = vsel %vm138_vm2, %v136_v20, %v109_v8  ;;  %v308_v12 = vmul.f32 %v358_v30, %v180_v25  ;;  %v155_v13 = vsel %vm147_vm3, %v146_v42, %v525_v14 }
  0xbc   :  { %v307_v44 = vmul.f32 %v357_v33, %v179_v41  ;;  %v154_v45 = vsel %vm147_vm3, %v145_v43, %v527_v15  ;;  %v246_v46 = vmul.f32 %v352_v36, %v501_v6  ;;  %v245_v47 = vmul.f32 %v351_v37, %v503_v7 }
  0xbd   :  { %v164_v49 = vsel %vm156_vm4, %v155_v13, %v111_v22  ;;  %v163_v51 = vsel %vm156_vm4, %v154_v45, %v109_v8  ;;  %v316_v52 = vadd.f32 %v308_v12, %v537_v32 }
  0xbe   :  { %v315_v53 = vadd.f32 %v307_v44, %v541_v35  ;;  %v173_v54 = vsel %vm165_vm5, %v164_v49, %v525_v14  ;;  %v172_v55 = vsel %vm165_vm5, %v163_v51, %v527_v15 }
  0xbf   :  { %v182_v6 = vsel %vm174_vm6, %v173_v54, %v111_v22  ;;  %v181_v7 = vsel %vm174_vm6, %v172_v55, %v109_v8  ;;  %324 = vst [vmem:[#allocation8 + $0xa] sm:$0x3] %v316_v52 }
  0xc0   :  { %323 = vst [vmem:[#allocation8 + $0x8] sm:$0x3] %v315_v53  ;;  %v310_v56 = vmul.f32 %v360_v48, %v182_v6  ;;  %v309_v57 = vmul.f32 %v359_v50, %v181_v7 }
  0xc2   :  { %v318_v58 = vadd.f32 %v310_v56, %v246_v46  ;;  %v317_v32 = vadd.f32 %v309_v57, %v245_v47 }
  0xc4   :  { %326 = vst [vmem:[#allocation8 + $0xe] sm:$0x3] %v318_v58  ;;  %325 = vst [vmem:[#allocation8 + $0xc] sm:$0x3] %v317_v32 }
  0xc5   :  { %441 = shalt.err (!%p438_p5)
}
  0xc6   :  { %338 = dma.vmem_to_hbm [thread:$0]  %s333_s30, 256, %s632_s3, [#allocation4], %s461_s1, %s461_s1, %s462_s27  }
  0xc7   :  { %454 = dma.done.wait [#allocation4], 256  }
  0xc8   :  { %455 = vsyncadd [#allocation4], 4294967040 }
  0xc9   :  { %342 = vsyncpa [#allocation3], 1 }
  0xca   :  { %343 = vsyncpa [#allocation6], 1 }
  0xcb   :  { %344 = vsyncpa [#allocation4], 1 }

</bundles_post_ra>
